<compile_context>
chip_gen: v6e
topology: v6e:2x2x1
jax: 0.10.0
libtpu: 0.0.40
codegen_flags: <defaults>
</compile_context>

<pallas_src>
import jax
import jax.numpy as jnp
from jax.experimental import pallas as pl
from jax.experimental.pallas import tpu as pltpu

IN_FEATURES = 28 * 28     # 784
H1 = 128
H2 = 64
N_CLASSES = 10

TILE_B_MAX = 2048         # generation-safe max rows per grid step
MIN_MEGACORE_TILES = 2    # keep >=2 grid steps so both v7x TensorCores get work


def _cdiv(a, b):
    return (a + b - 1) // b


def _round_up(v, m):
    return _cdiv(v, m) * m


def _mlp_kernel(x_ref, w1_ref, b1_ref, w2_ref, b2_ref, w3_ref, b3_ref, o_ref):
    # x tile arrives in its HBM dtype (f32 or bf16); cast to bf16 in-kernel so
    # no separate wrapper pass over HBM is needed.  MXU accumulates in f32.
    x = x_ref[...].astype(jnp.bfloat16)

    h1 = jnp.dot(x, w1_ref[...], preferred_element_type=jnp.float32) + b1_ref[...]
    h1 = jnp.maximum(h1, 0.0).astype(jnp.bfloat16)

    h2 = jnp.dot(h1, w2_ref[...], preferred_element_type=jnp.float32) + b2_ref[...]
    h2 = jnp.maximum(h2, 0.0).astype(jnp.bfloat16)

    logits = jnp.dot(h2, w3_ref[...], preferred_element_type=jnp.float32) + b3_ref[...]

    # Numerically stable log-softmax over the 10 real classes, kept in f32.
    m = jnp.max(logits, axis=-1, keepdims=True)
    shifted = logits - m
    lse = jnp.log(jnp.sum(jnp.exp(shifted), axis=-1, keepdims=True))
    o_ref[...] = shifted - lse


def prepare_params(params):
    """One-time weight prep: bf16 weights stored (in, out), f32 (1, out) biases.

    Call once per model (outside the forward / jit), then reuse."""
    w1, b1, w2, b2, w3, b3 = params
    return (w1.astype(jnp.bfloat16), b1.astype(jnp.float32).reshape(1, H1),
            w2.astype(jnp.bfloat16), b2.astype(jnp.float32).reshape(1, H2),
            w3.astype(jnp.bfloat16), b3.astype(jnp.float32).reshape(1, N_CLASSES))


def _choose_tile_b(B):
    # Split B into a small number of (nearly) equal tiles: big enough for DMA
    # efficiency, >= 2 tiles when possible (v7x megacore), minimal pad waste.
    n_tiles = max(_cdiv(B, TILE_B_MAX), MIN_MEGACORE_TILES if B >= 16 else 1)
    return min(_round_up(_cdiv(B, n_tiles), 8), _round_up(B, 8))


def _vmem_limit_bytes(tile_b, x_itemsize):
    x_tile = tile_b * IN_FEATURES * x_itemsize * 2            # double-buffered input
    out_tile = tile_b * N_CLASSES * 4 * 2                     # double-buffered output
    weights = 2 * (IN_FEATURES * H1 * 2 + H1 * H2 * 2 + H2 * N_CLASSES * 2
                   + (H1 + H2 + N_CLASSES) * 4)
    scratch = tile_b * (IN_FEATURES * 2 + 1536)               # bf16 x copy + activations
    est = int(1.25 * (x_tile + out_tile + weights + scratch)) + (1 << 20)
    # Stay well under v7x's 64 MiB physical VMEM; never below v5e's 16 MiB default.
    return max(16 << 20, min(est, 40 << 20))


def neural_net_forward(x, prepared_params):
    """x: anything reshapeable to (-1, 784), f32 or bf16.
    Returns (B, 10) f32 log-probabilities (LogSoftmax output)."""
    w1, b1, w2, b2, w3, b3 = prepared_params
    x2d = x.reshape(-1, IN_FEATURES)
    B = x2d.shape[0]

    tile_b = _choose_tile_b(B)
    grid = (_cdiv(B, tile_b),)
    x_itemsize = jnp.dtype(x2d.dtype).itemsize

    weight_bytes = ((IN_FEATURES * H1 + H1 * H2 + H2 * N_CLASSES) * 2
                    + (H1 + H2 + N_CLASSES) * 4)
    cost = pl.CostEstimate(
        flops=2 * B * (IN_FEATURES * H1 + H1 * H2 + H2 * N_CLASSES),
        transcendentals=B * (N_CLASSES + 1),
        bytes_accessed=B * (IN_FEATURES * x_itemsize + N_CLASSES * 4) + weight_bytes,
    )

    def resident(shape):
        # Weights/biases: constant block index -> fetched once, stay in VMEM.
        return pl.BlockSpec(shape, lambda i: (0, 0))

    return pl.pallas_call(
        _mlp_kernel,
        out_shape=jax.ShapeDtypeStruct((B, N_CLASSES), jnp.float32),
        grid=grid,
        in_specs=[
            pl.BlockSpec((tile_b, IN_FEATURES), lambda i: (i, 0)),  # x: batch-tiled
            resident((IN_FEATURES, H1)),
            resident((1, H1)),
            resident((H1, H2)),
            resident((1, H2)),
            resident((H2, N_CLASSES)),
            resident((1, N_CLASSES)),
        ],
        out_specs=pl.BlockSpec((tile_b, N_CLASSES), lambda i: (i, 0)),
        compiler_params=pltpu.CompilerParams(
            dimension_semantics=("parallel",),
            vmem_limit_bytes=_vmem_limit_bytes(tile_b, x_itemsize),
        ),
        cost_estimate=cost,
    )(x2d, w1, b1, w2, b2, w3, b3)


neural_net_forward = jax.jit(neural_net_forward)


def init_params(key):
    """Deterministic init matching nn.Linear shapes, stored as (in, out), f32."""
    k1, k2, k3, k4, k5, k6 = jax.random.split(key, 6)

    def linear_init(kw, kb, fan_in, fan_out):
        bound = 1.0 / jnp.sqrt(fan_in)
        w = jax.random.uniform(kw, (fan_in, fan_out), jnp.float32, -bound, bound)
        b = jax.random.uniform(kb, (1, fan_out), jnp.float32, -bound, bound)
        return w, b

    w1, b1 = linear_init(k1, k2, IN_FEATURES, H1)
    w2, b2 = linear_init(k3, k4, H1, H2)
    w3, b3 = linear_init(k5, k6, H2, N_CLASSES)
    return (w1, b1, w2, b2, w3, b3)


def _reference_forward(x, params):
    """Pure-JAX reference with the same bf16-operand / f32-accumulate recipe.

    Note: bf16 operands mean this (and the kernel) will not bit-match a pure
    f32 torch reference; 2e-3 tolerance is appropriate for log-probs."""
    w1, b1, w2, b2, w3, b3 = params
    h = x.reshape(-1, IN_FEATURES).astype(jnp.bfloat16)
    h = jnp.maximum(
        jnp.dot(h, w1.astype(jnp.bfloat16), preferred_element_type=jnp.float32)
        + b1.reshape(1, -1), 0.0).astype(jnp.bfloat16)
    h = jnp.maximum(
        jnp.dot(h, w2.astype(jnp.bfloat16), preferred_element_type=jnp.float32)
        + b2.reshape(1, -1), 0.0).astype(jnp.bfloat16)
    logits = jnp.dot(h, w3.astype(jnp.bfloat16),
                     preferred_element_type=jnp.float32) + b3.reshape(1, -1)
    return jax.nn.log_softmax(logits, axis=1)


if __name__ == "__main__":
    key = jax.random.PRNGKey(0)
    kp, kx = jax.random.split(key)

    params = init_params(kp)
    prepared = prepare_params(params)   # hoisted: once per model, reused per call

    x = jax.random.normal(kx, (2, 1, 28, 28), dtype=jnp.float32)

    out = jax.block_until_ready(neural_net_forward(x, prepared))

    ref = _reference_forward(x, params)
    assert out.shape == (2, 10), out.shape
    assert jnp.allclose(out, ref, atol=2e-3, rtol=2e-3), "mismatch vs JAX reference"

    print("KERNEL_OK")
</pallas_src>

<mosaic_0001>
module attributes {stable_mosaic.version = 11 : i64} {
  func.func @_mlp_kernel(%arg0: i32, %arg1: memref<8x784xf32, #tpu.memory_space<vmem>>, %arg2: memref<784x128xbf16, #tpu.memory_space<vmem>>, %arg3: memref<1x128xf32, #tpu.memory_space<vmem>>, %arg4: memref<128x64xbf16, #tpu.memory_space<vmem>>, %arg5: memref<1x64xf32, #tpu.memory_space<vmem>>, %arg6: memref<64x10xbf16, #tpu.memory_space<vmem>>, %arg7: memref<1x10xf32, #tpu.memory_space<vmem>>, %arg8: memref<8x10xf32, #tpu.memory_space<vmem>>) attributes {dimension_semantics = [#tpu.dimension_semantics<parallel>], iteration_bounds = array<i64: 1>, scalar_prefetch = 0 : i64, scratch_operands = 0 : i64, tpu.core_type = #tpu.core_type<tc>, window_params = [{transform_indices = @transform_0, window_bounds = array<i64: 8, 784>}, {pipeline_mode = #tpu.pipeline_mode<synchronous>, transform_indices = @transform_1, window_bounds = array<i64: 784, 128>}, {pipeline_mode = #tpu.pipeline_mode<synchronous>, transform_indices = @transform_2, window_bounds = array<i64: 1, 128>}, {pipeline_mode = #tpu.pipeline_mode<synchronous>, transform_indices = @transform_3, window_bounds = array<i64: 128, 64>}, {pipeline_mode = #tpu.pipeline_mode<synchronous>, transform_indices = @transform_4, window_bounds = array<i64: 1, 64>}, {pipeline_mode = #tpu.pipeline_mode<synchronous>, transform_indices = @transform_5, window_bounds = array<i64: 64, 10>}, {pipeline_mode = #tpu.pipeline_mode<synchronous>, transform_indices = @transform_6, window_bounds = array<i64: 1, 10>}, {transform_indices = @transform_7, window_bounds = array<i64: 8, 10>}]} {
    %c0 = arith.constant 0 : index
    %c0_0 = arith.constant 0 : index
    %0 = vector.load %arg1[%c0, %c0_0] : memref<8x784xf32, #tpu.memory_space<vmem>>, vector<8x784xf32>
    %1 = arith.truncf %0 : vector<8x784xf32> to vector<8x784xbf16>
    %c0_1 = arith.constant 0 : index
    %c0_2 = arith.constant 0 : index
    %2 = vector.load %arg2[%c0_1, %c0_2] : memref<784x128xbf16, #tpu.memory_space<vmem>>, vector<784x128xbf16>
    %cst = arith.constant dense<0.000000e+00> : vector<8x128xf32>
    %3 = tpu.matmul %1, %2, %cst {dimension_numbers = #tpu.dot_dimension_numbers<[1], [0], [0], [1], [0, 0, 1, 1], [], []>} : vector<8x784xbf16>, vector<784x128xbf16>, vector<8x128xf32> -> vector<8x128xf32>
    %c0_3 = arith.constant 0 : index
    %c0_4 = arith.constant 0 : index
    %4 = vector.load %arg3[%c0_3, %c0_4] : memref<1x128xf32, #tpu.memory_space<vmem>>, vector<1x128xf32>
    %5 = vector.broadcast %4 : vector<1x128xf32> to vector<8x128xf32>
    %6 = arith.addf %3, %5 : vector<8x128xf32>
    %cst_5 = arith.constant 0.000000e+00 : f32
    %7 = vector.broadcast %cst_5 : f32 to vector<8x128xf32>
    %8 = arith.maximumf %6, %7 : vector<8x128xf32>
    %9 = arith.truncf %8 : vector<8x128xf32> to vector<8x128xbf16>
    %c0_6 = arith.constant 0 : index
    %c0_7 = arith.constant 0 : index
    %10 = vector.load %arg4[%c0_6, %c0_7] : memref<128x64xbf16, #tpu.memory_space<vmem>>, vector<128x64xbf16>
    %cst_8 = arith.constant dense<0.000000e+00> : vector<8x64xf32>
    %11 = tpu.matmul %9, %10, %cst_8 {dimension_numbers = #tpu.dot_dimension_numbers<[1], [0], [0], [1], [0, 0, 1, 1], [], []>} : vector<8x128xbf16>, vector<128x64xbf16>, vector<8x64xf32> -> vector<8x64xf32>
    %c0_9 = arith.constant 0 : index
    %c0_10 = arith.constant 0 : index
    %12 = vector.load %arg5[%c0_9, %c0_10] : memref<1x64xf32, #tpu.memory_space<vmem>>, vector<1x64xf32>
    %13 = vector.broadcast %12 : vector<1x64xf32> to vector<8x64xf32>
    %14 = arith.addf %11, %13 : vector<8x64xf32>
    %cst_11 = arith.constant 0.000000e+00 : f32
    %15 = vector.broadcast %cst_11 : f32 to vector<8x64xf32>
    %16 = arith.maximumf %14, %15 : vector<8x64xf32>
    %17 = arith.truncf %16 : vector<8x64xf32> to vector<8x64xbf16>
    %c0_12 = arith.constant 0 : index
    %c0_13 = arith.constant 0 : index
    %18 = vector.load %arg6[%c0_12, %c0_13] : memref<64x10xbf16, #tpu.memory_space<vmem>>, vector<64x10xbf16>
    %cst_14 = arith.constant dense<0.000000e+00> : vector<8x10xf32>
    %19 = tpu.matmul %17, %18, %cst_14 {dimension_numbers = #tpu.dot_dimension_numbers<[1], [0], [0], [1], [0, 0, 1, 1], [], []>} : vector<8x64xbf16>, vector<64x10xbf16>, vector<8x10xf32> -> vector<8x10xf32>
    %c0_15 = arith.constant 0 : index
    %c0_16 = arith.constant 0 : index
    %20 = vector.load %arg7[%c0_15, %c0_16] : memref<1x10xf32, #tpu.memory_space<vmem>>, vector<1x10xf32>
    %21 = vector.broadcast %20 : vector<1x10xf32> to vector<8x10xf32>
    %22 = arith.addf %19, %21 : vector<8x10xf32>
    %cst_17 = arith.constant dense<0xFF800000> : vector<8xf32>
    %23 = vector.multi_reduction <maximumf>, %22, %cst_17 [1] : vector<8x10xf32> to vector<8xf32>
    %24 = vector.shape_cast %23 : vector<8xf32> to vector<8x1xf32>
    %25 = vector.broadcast %24 : vector<8x1xf32> to vector<8x10xf32>
    %26 = arith.subf %22, %25 : vector<8x10xf32>
    %27 = math.exp %26 : vector<8x10xf32>
    %cst_18 = arith.constant dense<0.000000e+00> : vector<8xf32>
    %28 = vector.multi_reduction <add>, %27, %cst_18 [1] : vector<8x10xf32> to vector<8xf32>
    %29 = vector.shape_cast %28 : vector<8xf32> to vector<8x1xf32>
    %30 = math.log %29 : vector<8x1xf32>
    %31 = vector.broadcast %30 : vector<8x1xf32> to vector<8x10xf32>
    %32 = arith.subf %26, %31 : vector<8x10xf32>
    %c0_19 = arith.constant 0 : index
    %c0_20 = arith.constant 0 : index
    %33 = vector.load %arg8[%c0_19, %c0_20] : memref<8x10xf32, #tpu.memory_space<vmem>>, vector<8x10xf32>
    tpu.vector_store %arg8[%c0_19, %c0_20], %32 {strides = array<i32>} : memref<8x10xf32, #tpu.memory_space<vmem>>, vector<8x10xf32>,
    return
  }
  func.func @transform_0(%arg0: i32) -> (i32, i32) {
    %c0_i32 = arith.constant 0 : i32
    %c0_i32_0 = arith.constant 0 : i32
    return %arg0, %c0_i32 : i32, i32
  }
  func.func @transform_1(%arg0: i32) -> (i32, i32) {
    %c0_i32 = arith.constant 0 : i32
    %c0_i32_0 = arith.constant 0 : i32
    %c0_i32_1 = arith.constant 0 : i32
    return %c0_i32, %c0_i32_0 : i32, i32
  }
  func.func @transform_2(%arg0: i32) -> (i32, i32) {
    %c0_i32 = arith.constant 0 : i32
    %c0_i32_0 = arith.constant 0 : i32
    %c0_i32_1 = arith.constant 0 : i32
    return %c0_i32, %c0_i32_0 : i32, i32
  }
  func.func @transform_3(%arg0: i32) -> (i32, i32) {
    %c0_i32 = arith.constant 0 : i32
    %c0_i32_0 = arith.constant 0 : i32
    %c0_i32_1 = arith.constant 0 : i32
    return %c0_i32, %c0_i32_0 : i32, i32
  }
  func.func @transform_4(%arg0: i32) -> (i32, i32) {
    %c0_i32 = arith.constant 0 : i32
    %c0_i32_0 = arith.constant 0 : i32
    %c0_i32_1 = arith.constant 0 : i32
    return %c0_i32, %c0_i32_0 : i32, i32
  }
  func.func @transform_5(%arg0: i32) -> (i32, i32) {
    %c0_i32 = arith.constant 0 : i32
    %c0_i32_0 = arith.constant 0 : i32
    %c0_i32_1 = arith.constant 0 : i32
    return %c0_i32, %c0_i32_0 : i32, i32
  }
  func.func @transform_6(%arg0: i32) -> (i32, i32) {
    %c0_i32 = arith.constant 0 : i32
    %c0_i32_0 = arith.constant 0 : i32
    %c0_i32_1 = arith.constant 0 : i32
    return %c0_i32, %c0_i32_0 : i32, i32
  }
  func.func @transform_7(%arg0: i32) -> (i32, i32) {
    %c0_i32 = arith.constant 0 : i32
    %c0_i32_0 = arith.constant 0 : i32
    return %arg0, %c0_i32 : i32, i32
  }
}

</mosaic_0001>

<bundles_post_ra>
// kernel: neural_net_forward.1
= control target key start
LH: loop header
LB: loop body
LE: loop exit
PB: predicated region body
PF: predicated region fallthrough
CT: control target
= control target key end

     0   :  { %12 = vsyncpa [#allocation3], 0  ;;  %s1408_s0 = inlined_call_operand.vmem [shape: f32[2,784], index: 0, kind: input, shape index: {}]   ;;  %s1409_s1 = inlined_call_operand.hbm [shape: bf16[784,128], index: 1, kind: input, shape index: {}]   ;;  %s1410_s2 = inlined_call_operand.vmem [shape: f32[1,128], index: 2, kind: input, shape index: {}]   ;;  %s1411_s3 = inlined_call_operand.vmem [shape: bf16[128,64], index: 3, kind: input, shape index: {}]   ;;  %s1412_s4 = inlined_call_operand.vmem [shape: f32[1,64], index: 4, kind: input, shape index: {}]   ;;  %s1413_s5 = inlined_call_operand.vmem [shape: bf16[64,10], index: 5, kind: input, shape index: {}]   ;;  %s1414_s6 = inlined_call_operand.vmem [shape: f32[1,10], index: 6, kind: input, shape index: {}]   ;;  %s1415_s7 = inlined_call_operand.hbm [shape: f32[2,10], index: 7, kind: output, shape index: {}]  }
   0x1   :  { %13 = vsyncpa [#allocation4], 0  ;;  %s1251_s24 = smov [#allocation2]  }
   0x2   :  { %s21_s25 = sshll.u32 %s1251_s24, 4  ;;  %s22_s25 = int_to_ptr.vmem [resolvable:$true] %s21_s25 }
   0x3   :  { %s1215_s26 = scalar_lea.vmem %s22_s25, 6272  ;;  %p1220_p1 = scmp.lt.s32.totalorder %s22_s25, %s22_s25 }
   0x4   :  { %p1216_p0 = scmp.ne.s32.totalorder %s22_s25, %s1215_s26  ;;  %p1221_p2 = scmp.lt.s32.totalorder %s1215_s26, %s1215_s26 }
   0x6   :  { %p1222_p3 = por %p1221_p2, %p1220_p1 }
   0x8   :  { %p1223_p4 = pnand %p1222_p3, %p1216_p0 }
   0xa   :  { %1226 = shalt.err (!%p1223_p4)
}
   0xb   :  { %s1252_s27 = smov 64   ;;  %s1253_s28 = smov 4  }
   0xc   :  { %27 = dma.hbm_to_vmem [thread:$0]  %s1409_s1, 6272, %s22_s25, [#allocation3], %s1252_s27, %s1252_s27, %s1253_s28  }
   0xd   :  { %1247 = dma.done.wait [#allocation3], 6272  }
   0xe   :  { %1248 = vsyncadd [#allocation3], 4294961024  ;;  %v1130_v0 = vld [vmem:[#allocation2 + $0x78] sm:$0xff]   ;;  %v1134_v4 = vld [vmem:[#allocation2 + $0x70] sm:$0xff]   ;;  %v1254_v23 = vmov 1983009808   ;;  %v65_v25 = vlaneseq }
   0xf   :  { %v1131_v1 = vld [vmem:[#allocation2 + $0x38] sm:$0xff]   ;;  %1001 = vmatprep.subr.bf16.mxu0 %v1130_v0  ;;  %v1135_v5 = vld [vmem:[#allocation2 + $0x30] sm:$0xff]   ;;  %v1138_v8 = vld [vmem:[#allocation2 + $0x68] sm:$0xff]   ;;  %v63_v24 = vunpack.c.l.s4 %v1254_v23  ;;  %v1255_v47 = vmov 0.0   ;;  %vm1256_vm0 = vmmov 0   ;;  %vm542_vm1 = vcmask 130048  }
  0x10   :  { %v1132_v2 = vld [vmem:[#allocation2 + $0xf8] sm:$0xff]   ;;  %1002 = vmatpush3.bf16.msra.mxu0 %v1131_v1  ;;  %v1136_v6 = vld [vmem:[#allocation2 + $0xf0] sm:$0xff]   ;;  %v1139_v9 = vld [vmem:[#allocation2 + $0x28] sm:$0xff]   ;;  %v66_v31 = vshrl.u32 %v65_v25, 7  ;;  %vm860_vm2 = vcmask 523264   ;;  %vm904_vm3 = vcmask 80896  }
  0x11   :  { %v1133_v3 = vld [vmem:[#allocation2 + $0xb8] sm:$0xff]   ;;  %1023 = vmatprep.subr.bf16.mxu1 %v1132_v2  ;;  %1003 = vmatprep.subr.bf16.mxu0 %v1134_v4  ;;  %v1137_v7 = vld [vmem:[#allocation2 + $0xb0] sm:$0xff]   ;;  %v1140_v10 = vld [vmem:[#allocation2 + $0xe8] sm:$0xff]   ;;  %v64_v30 = vunpack.c.0.s8 %v63_v24 }
  0x12   :  { %1024 = vmatpush3.bf16.msra.mxu1 %v1133_v3  ;;  %v1141_v11 = vld [vmem:[#allocation2 + $0xa8] sm:$0xff]   ;;  %v1142_v12 = vld [vmem:[#allocation2 + $0x60] sm:$0xff]   ;;  %v1146_v16 = vld [vmem:[#allocation2 + $0x58] sm:$0xff]  }
  0x13   :  { %1025 = vmatprep.subr.bf16.mxu1 %v1136_v6  ;;  %v1143_v13 = vld [vmem:[#allocation2 + $0x20] sm:$0xff]   ;;  %v1147_v17 = vld [vmem:[#allocation2 + $0x18] sm:$0xff]   ;;  %v1150_v20 = vld [vmem:[#allocation2 + $0x50] sm:$0xff]   ;;  %v1303_v36 = vsub.s32 %v64_v30, %v66_v31 }
  0x14   :  { %1004 = vmatpush3.bf16.msra.mxu0 %v1135_v5  ;;  %v1144_v14 = vld [vmem:[#allocation2 + $0xe0] sm:$0xff]   ;;  %v1148_v18 = vld [vmem:[#allocation2 + $0xd8] sm:$0xff]   ;;  %v1151_v21 = vld [vmem:[#allocation2 + $0x10] sm:$0xff]  }
  0x15   :  { %1005 = vmatprep.subr.bf16.mxu0 %v1138_v8  ;;  %v1145_v15 = vld [vmem:[#allocation2 + $0xa0] sm:$0xff]   ;;  %v1149_v19 = vld [vmem:[#allocation2 + $0x98] sm:$0xff]   ;;  %v1152_v22 = vld [vmem:[#allocation2 + $0xd0] sm:$0xff]  }
  0x16   :  { %1026 = vmatpush3.bf16.msra.mxu1 %v1137_v7  ;;  %v1153_v26 = vld [vmem:[#allocation2 + $0x90] sm:$0xff]   ;;  %v1154_v27 = vld [vmem:[#allocation2 + $0x48] sm:$0xff]   ;;  %v1158_v33 = vld [vmem:[#allocation2 + $0x40] sm:$0xff]  }
  0x17   :  { %1027 = vmatprep.subr.bf16.mxu1 %v1140_v10  ;;  %v1155_v28 = vld [vmem:[#allocation2 + $0x8] sm:$0xff]   ;;  %v1159_v34 = vld [vmem:[#allocation2] sm:$0xff]   ;;  %v1166_v42 = vld [vmem:[#allocation2 + $0x178] sm:$0xff]  }
  0x18   :  { %1006 = vmatpush3.bf16.msra.mxu0 %v1139_v9  ;;  %v1156_v29 = vld [vmem:[#allocation2 + $0xc8] sm:$0xff]   ;;  %v1160_v35 = vld [vmem:[#allocation2 + $0xc0] sm:$0xff]   ;;  %v1169_v52 = vld [vmem:[#allocation2 + $0x138] sm:$0xff]  }
  0x19   :  { %1007 = vmatprep.subr.bf16.mxu0 %v1142_v12  ;;  %v1157_v32 = vld [vmem:[#allocation2 + $0x88] sm:$0xff]   ;;  %v1165_v39 = vld [vmem:[#allocation2 + $0x80] sm:$0xff]   ;;  %v1170_v55 = vld [vmem:[#allocation2 + $0x170] sm:$0xff]  }
  0x1a   :  { %1028 = vmatpush3.bf16.msra.mxu1 %v1141_v11  ;;  %v1161_v37 = vld [vmem:[%s1408_s0] ss:$14 sps:$4 sm:$0xff]   ;;  %v1163_v38 = vld [vmem:[%s1408_s0 + $0x1c] ss:$14 sps:$4 sm:$0xff]   ;;  %v1167_v43 = vld [vmem:[%s1408_s0 + $0x4] ss:$14 sps:$4 sm:$0xff]  }
  0x1b   :  { %1029 = vmatprep.subr.bf16.mxu1 %v1144_v14  ;;  %v68_v40 = vrot.slane %v1161_v37, %v1303_v36  ;;  %v82_v41 = vrot.slane %v1163_v38, %v1303_v36  ;;  %v1168_v44 = vld [vmem:[%s1408_s0 + $0x20] ss:$14 sps:$4 sm:$0xff]   ;;  %v75_v48 = vrot.slane %v1167_v43, %v1303_v36  ;;  %v1176_v63 = vld [vmem:[#allocation2 + $0x158] sm:$0xff]   ;;  %v1188_v5 = vld [vmem:[%s1408_s0 + $0x24] ss:$14 sps:$4 sm:$0xff]  }
  0x1c   :  { %1008 = vmatpush3.bf16.msra.mxu0 %v1143_v13  ;;  %v89_v49 = vrot.slane %v1168_v44, %v1303_v36  ;;  %v1171_v58 = vld [vmem:[#allocation2 + $0x130] sm:$0xff]   ;;  %v1172_v59 = vld [vmem:[#allocation2 + $0x168] sm:$0xff]   ;;  %v1174_v61 = vld [vmem:[#allocation2 + $0x160] sm:$0xff]   ;;  %v118_v10 = vrot.slane %v1188_v5, %v1303_v36 }
  0x1d   :  { %1009 = vmatprep.subr.bf16.mxu0 %v1146_v16  ;;  %v91_v45 = vcombine.high %v68_v40, %v82_v41  ;;  %v90_v46 = vcombine.low %v68_v40, %v82_v41  ;;  %v1173_v60 = vld [vmem:[#allocation2 + $0x128] sm:$0xff]   ;;  %v1175_v62 = vld [vmem:[#allocation2 + $0x120] sm:$0xff]   ;;  %v1177_v1 = vld [vmem:[#allocation2 + $0x118] sm:$0xff]  }
  0x1e   :  { %1030 = vmatpush3.bf16.msra.mxu1 %v1145_v15  ;;  %v93_v53 = vcombine.high %v75_v48, %v89_v49  ;;  %v92_v54 = vcombine.low %v75_v48, %v89_v49  ;;  %v1184_v0 = vld [vmem:[#allocation2 + $0x180] sm:$0xff]   ;;  %v1185_v2 = vld [vmem:[%s1408_s0 + $0x8] ss:$14 sps:$4 sm:$0xff]   ;;  %v1187_v3 = vld [vmem:[%s1408_s0 + $0xc] ss:$14 sps:$4 sm:$0x33]  }
  0x1f   :  { %1031 = vmatprep.subr.bf16.mxu1 %v1148_v18  ;;  %v137_v50 = vpack.c.bf16 %v91_v45, %v91_v45  ;;  %v136_v51 = vpack.c.bf16 %v90_v46, %v90_v46  ;;  %v1178_v4 = vld [vmem:[#allocation2 + $0x150] sm:$0xff]   ;;  %v104_v7 = vrot.slane %v1185_v2, %v1303_v36  ;;  %v111_v8 = vrot.slane %v1187_v3, %v1303_v36  ;;  %v1180_v12 = vld [vmem:[#allocation2 + $0x148] sm:$0xff]   ;;  %v1182_v18 = vld [vmem:[#allocation2 + $0x140] sm:$0xff]  }
  0x20   :  { %1010 = vmatpush3.bf16.msra.mxu0 %v1147_v17  ;;  %v139_v56 = vpack.c.bf16 %v93_v53, %v93_v53  ;;  %v138_v57 = vpack.c.bf16 %v92_v54, %v92_v54  ;;  %v1190_v6 = vld [vmem:[%s1408_s0 + $0x28] ss:$14 sps:$4 sm:$0x33]   ;;  %v1194_v25 = vld [vmem:[%s1411_s3 + $0x20] sm:$0xff]   ;;  %v1199_v30 = vld [vmem:[%s1413_s5 + $0x18] sm:$0xff]  }
  0x21   :  { %1011 = vmatprep.subr.bf16.mxu0 %v1150_v20  ;;  %578 = vmatprep.mubr.bf16.mxu0 %v137_v50  ;;  %v1179_v9 = vld [vmem:[#allocation2 + $0x110] sm:$0xff]   ;;  %v125_v11 = vrot.slane %v1190_v6, %v1303_v36  ;;  %v127_v13 = vcombine.high %v104_v7, %v118_v10  ;;  %v1181_v15 = vld [vmem:[#allocation2 + $0x108] sm:$0xff]   ;;  %v1183_v20 = vld [vmem:[#allocation2 + $0x100] sm:$0xff]  }
  0x22   :  { %1032 = vmatpush3.bf16.msra.mxu1 %v1149_v19  ;;  %618 = vmatprep.mubr.bf16.mxu1 %v139_v56  ;;  %v126_v19 = vcombine.low %v104_v7, %v118_v10  ;;  %v1192_v23 = vld [vmem:[%s1411_s3 + $0x30] sm:$0xff]   ;;  %v1193_v24 = vld [vmem:[%s1411_s3 + $0x28] sm:$0xff]   ;;  %v935_v44 = vld [vmem:[%s1410_s2] ss:$0 sm:$0xff] }
  0x23   :  { %1033 = vmatprep.subr.bf16.mxu1 %v1152_v22  ;;  %v128_v14 = vcombine.low %v111_v8, %v125_v11  ;;  %v141_v16 = vpack.c.bf16 %v127_v13, %v127_v13  ;;  %v1191_v22 = vld [vmem:[%s1411_s3 + $0x38] sm:$0xff]   ;;  %v1200_v31 = vld [vmem:[%s1413_s5 + $0x10] sm:$0xff]  }
  0x24   :  { %1012 = vmatpush3.bf16.msra.mxu0 %v1151_v21  ;;  %v140_v21 = vpack.c.bf16 %v126_v19, %v126_v19 }
  0x25   :  { %1013 = vmatprep.subr.bf16.mxu0 %v1154_v27  ;;  %v142_v17 = vpack.c.bf16 %v128_v14, %v128_v14  ;;  %v1196_v27 = vld [vmem:[%s1411_s3 + $0x10] sm:$0xff]  }
  0x26   :  { %1034 = vmatpush3.bf16.msra.mxu1 %v1153_v26  ;;  %v1195_v26 = vld [vmem:[%s1411_s3 + $0x18] sm:$0xff]  }
  0x27   :  { %1035 = vmatprep.subr.bf16.mxu1 %v1156_v29  ;;  %v1198_v29 = vld [vmem:[%s1411_s3] sm:$0xff]  }
  0x28   :  { %1014 = vmatpush3.bf16.msra.mxu0 %v1155_v28  ;;  %v1197_v28 = vld [vmem:[%s1411_s3 + $0x8] sm:$0xff]  }
  0x29   :  { %1015 = vmatprep.subr.bf16.mxu0 %v1158_v33 }
  0x2a   :  { %1036 = vmatpush3.bf16.msra.mxu1 %v1157_v32 }
  0x2b   :  { %1037 = vmatprep.subr.bf16.mxu1 %v1160_v35 }
  0x2c   :  { %1016 = vmatpush3.bf16.msra.mxu0 %v1159_v34 }
  0x2d   :  { %1045 = vmatprep.subr.bf16.mxu0 %v1166_v42 }
  0x2e   :  { %1038 = vmatpush3.bf16.msra.mxu1 %v1165_v39 }
  0x2f   :  { %1083 = vmatprep.subr.bf16.mxu1 %v1255_v47  ;;  %579 = vmatmul.mubr.bf16.vlgmr.msra.gmra.mxu0 %v136_v51 }
  0x30   :  { %1046 = vmatpush3.bf16.msra.mxu0 %v1169_v52  ;;  %658 = vmatprep.mubr.bf16.mxu0 %v141_v16 }
  0x31   :  { %1047 = vmatprep.subr.bf16.mxu0 %v1170_v55  ;;  %619 = vmatmul.mubr.bf16.vlgmr.msra.gmra.mxu1 %v138_v57 }
  0x32   :  { %1085 = vmatprep.mubr.msk.bf16.mxu1 %vm1256_vm0, %v1255_v47  ;;  %1084 = vmatpush3.bf16.msra.mxu1 %v1184_v0 }
  0x33   :  { %1089 = vmatprep.subr.bf16.mxu1 %v1255_v47 }
  0x34   :  { %1048 = vmatpush3.bf16.msra.mxu0 %v1171_v58 }
  0x35   :  { %1049 = vmatprep.subr.bf16.mxu0 %v1172_v59  ;;  %v1201_v59 = vld [vmem:[%s1413_s5 + $0x8] sm:$0xff]  }
  0x38   :  { %1050 = vmatpush3.bf16.msra.mxu0 %v1173_v60  ;;  %v1202_v60 = vld [vmem:[%s1413_s5] sm:$0xff]  }
  0x39   :  { %1051 = vmatprep.subr.bf16.mxu0 %v1174_v61  ;;  %1086 = vmatmul.mubr.msk.bf16.vlgmr.msra.gmra.mxu1 %vm542_vm1, %v142_v17  ;;  %v986_v61 = vld [vmem:[%s1412_s4] ss:$0 sm:$0xff] }
  0x3a   :  { %1105 = vmatprep.mubr.msk.bf16.mxu1 %vm1256_vm0, %v1255_v47  ;;  %1090 = vmatpush3.bf16.msra.mxu1 %v1191_v22 }
  0x3b   :  { %1091 = vmatprep.subr.bf16.mxu1 %v1255_v47 }
  0x3c   :  { %1052 = vmatpush3.bf16.msra.mxu0 %v1175_v62 }
  0x3d   :  { %1053 = vmatprep.subr.bf16.mxu0 %v1176_v63 }
  0x3e   :  { %1092 = vmatpush3.bf16.msra.mxu1 %v1192_v23 }
  0x3f   :  { %1093 = vmatprep.subr.bf16.mxu1 %v1255_v47 }
  0x40   :  { %1054 = vmatpush3.bf16.msra.mxu0 %v1177_v1 }
  0x41   :  { %1055 = vmatprep.subr.bf16.mxu0 %v1178_v4 }
  0x42   :  { %1094 = vmatpush3.bf16.msra.mxu1 %v1193_v24 }
  0x43   :  { %1095 = vmatprep.subr.bf16.mxu1 %v1255_v47 }
  0x44   :  { %1056 = vmatpush3.bf16.msra.mxu0 %v1179_v9 }
  0x45   :  { %1057 = vmatprep.subr.bf16.mxu0 %v1180_v12 }
  0x46   :  { %1096 = vmatpush3.bf16.msra.mxu1 %v1194_v25 }
  0x47   :  { %1097 = vmatprep.subr.bf16.mxu1 %v1255_v47 }
  0x48   :  { %1058 = vmatpush3.bf16.msra.mxu0 %v1181_v15 }
  0x49   :  { %1059 = vmatprep.subr.bf16.mxu0 %v1182_v18 }
  0x4a   :  { %1098 = vmatpush3.bf16.msra.mxu1 %v1195_v26 }
  0x4b   :  { %1099 = vmatprep.subr.bf16.mxu1 %v1255_v47 }
  0x4c   :  { %1060 = vmatpush3.bf16.msra.mxu0 %v1183_v20 }
  0x4d   :  { %1109 = vmatprep.subr.bf16.mxu0 %v1255_v47 }
  0x4e   :  { %1100 = vmatpush3.bf16.msra.mxu1 %v1196_v27 }
  0x4f   :  { %659 = vmatmul.mubr.bf16.vlgmr.msra.gmra.mxu0 %v140_v21  ;;  %1101 = vmatprep.subr.bf16.mxu1 %v1255_v47 }
  0x50   :  { %1117 = vmatprep.mubr.msk.bf16.mxu0 %vm1256_vm0, %v1255_v47  ;;  %1110 = vmatpush3.bf16.msra.mxu0 %v1199_v30 }
  0x51   :  { %1111 = vmatprep.subr.bf16.mxu0 %v1255_v47 }
  0x52   :  { %1102 = vmatpush3.bf16.msra.mxu1 %v1197_v28 }
  0x53   :  { %1103 = vmatprep.subr.bf16.mxu1 %v1255_v47 }
  0x54   :  { %1112 = vmatpush3.bf16.msra.mxu0 %v1200_v31 }
  0x55   :  { %1113 = vmatprep.subr.bf16.mxu0 %v1255_v47 }
  0x56   :  { %1104 = vmatpush3.bf16.msra.mxu1 %v1198_v29 }
  0x58   :  { %1114 = vmatpush3.bf16.msra.mxu0 %v1201_v59 }
  0x59   :  { %1115 = vmatprep.subr.bf16.mxu0 %v1255_v47  ;;  %v995_v47 = vld [vmem:[%s1414_s6] ss:$0 sm:$0xff] }
  0x5c   :  { %1116 = vmatpush3.bf16.msra.mxu0 %v1202_v60 }
  0xef   :  { %v1017_v32 = vpop.f32.mrf.mxu0 }
  0xf1   :  { %v1018_v33 = vpop.f32.mrf.mxu0  ;;  %v1039_v34 = vpop.f32.mrf.mxu1 }
  0xf2   :  { %v1019_v43 = vadd.f32 %v1018_v33, %v1017_v32 }
  0xf3   :  { %v1020_v35 = vpop.f32.mrf.mxu0  ;;  %v1040_v36 = vpop.f32.mrf.mxu1 }
  0xf4   :  { %v581_v46 = vadd.f32 %v1019_v43, %v935_v44  ;;  %v1041_v48 = vadd.f32 %v1040_v36, %v1039_v34 }
  0xf5   :  { %v1021_v37 = vpop.f32.mrf.mxu0  ;;  %v1042_v38 = vpop.f32.mrf.mxu1 }
  0xf6   :  { %v621_v51 = vadd.f32 %v1041_v48, %v581_v46 }
  0xf7   :  { %v1043_v39 = vpop.f32.mrf.mxu1 }
  0xf9   :  { %v700_v40 = vpop.f32.mrf.mxu1 }
  0xfb   :  { %v1087_v41 = vpop.f32.mrf.mxu1 }
  0xfd   :  { %v703_v42 = vpop.f32.mrf.mxu1 }
  0xff   :  { %v1088_v45 = vpop.f32.mrf.mxu1 }
 0x10f   :  { %v1061_v49 = vpop.f32.mrf.mxu0 }
 0x111   :  { %v1062_v50 = vpop.f32.mrf.mxu0 }
 0x112   :  { %v1063_v52 = vadd.f32 %v1062_v50, %v1061_v49 }
 0x113   :  { %v1064_v53 = vpop.f32.mrf.mxu0 }
 0x114   :  { %v661_v54 = vadd.f32 %v1063_v52, %v621_v51 }
 0x115   :  { %v1065_v55 = vpop.f32.mrf.mxu0 }
 0x116   :  { %v701_v56 = vadd.f32 %v700_v40, %v661_v54 }
 0x118   :  { %v706_v57 = vmax.f32 %v701_v56, 0.0 }
 0x11a   :  { %v707_v58 = vpack.c.bf16 %v706_v57, %v706_v57 }
 0x11c   :  { %1106 = vmatmul.mubr.bf16.vlgmr.msra.gmra.mxu1 %v707_v58 }
 0x1dc   :  { %v813_v62 = vpop.f32.mrf.mxu1 }
 0x1dd   :  { %v814_v63 = vadd.f32 %v986_v61, %v813_v62 }
 0x1de   :  { %v1107_v0 = vpop.f32.mrf.mxu1 }
 0x1df   :  { %v819_v1 = vmax.f32 %v814_v63, 0.0 }
 0x1e0   :  { %v816_v2 = vpop.f32.mrf.mxu1 }
 0x1e1   :  { %v820_v3 = vpack.c.bf16 %v819_v1, %v819_v1 }
 0x1e2   :  { %v1108_v4 = vpop.f32.mrf.mxu1 }
 0x1e3   :  { %1118 = vmatmul.mubr.msk.bf16.vlgmr.msra.gmra.mxu0 %vm860_vm2, %v820_v3 }
 0x2a3   :  { %v898_v5 = vpop.f32.mrf.mxu0 }
 0x2a4   :  { %v899_v6 = vadd.f32 %v995_v47, %v898_v5 }
 0x2a5   :  { %v1119_v7 = vpop.f32.mrf.mxu0 }
 0x2a6   :  { %v905_v8 = vsel %vm904_vm3, %v899_v6, -inf }
 0x2a7   :  { %906 = vmax.xlane.f32.xlu0 %v905_v8  ;;  %v901_v9 = vpop.f32.mrf.mxu0 }
 0x2a9   :  { %v1120_v10 = vpop.f32.mrf.mxu0 }
 0x330   :  { %v907_v11 = vpop.xlane.xlu0 %906 }
 0x331   :  { %v908_v12 = vsub.f32 %v899_v6, %v907_v11 }
 0x333   :  { %v909_v13 = vmul.f32 1.442695, %v908_v12 }
 0x335   :  { %1203 = vpow2.f32 %v909_v13 }
 0x342   :  { %v1204_v14 = vpop.eup %1203 }
 0x343   :  { %v911_v15 = vsel %vm904_vm3, %v1204_v14, 0.0 }
 0x344   :  { %912 = vadd.xlane.f32.xlu0 %v911_v15 }
 0x3cd   :  { %v913_v16 = vpop.xlane.xlu0 %912 }
 0x3ce   :  { %1205 = vlog2.f32 %v913_v16 }
 0x3db   :  { %v1206_v17 = vpop.eup %1205 }
 0x3dc   :  { %v915_v18 = vmul.f32 0.6931472, %v1206_v17 }
 0x3de   :  { %v916_v19 = vsub.f32 %v908_v12, %v915_v18 }
 0x3e0   :  { %917 = vst.msk [vmem:[#allocation5] sm:$0xff] %vm904_vm3, %v916_v19 }
 0x3e1   :  { %922 = vsyncadd [#allocation4], 96  ;;  %s1257_s4 = smov [#allocation5]  }
 0x3e2   :  { %s923_s5 = sshll.u32 %s1257_s4, 4  ;;  %s924_s5 = int_to_ptr.vmem [resolvable:$true] %s923_s5 }
 0x3e3   :  { %s1227_s6 = scalar_lea.vmem %s924_s5, 32  ;;  %s1231_s25 = scalar_lea.vmem %s924_s5, 128 }
 0x3e4   :  { %p1228_p5 = scmp.ne.s32.totalorder %s924_s5, %s1227_s6  ;;  %p1232_p6 = scmp.lt.s32.totalorder %s924_s5, %s924_s5 }
 0x3e5   :  { %p1233_p7 = scmp.lt.s32.totalorder %s1231_s25, %s1227_s6 }
 0x3e7   :  { %p1234_p8 = por %p1233_p7, %p1232_p6 }
 0x3e9   :  { %p1235_p9 = pnand %p1234_p8, %p1228_p5 }
 0x3eb   :  { %1238 = shalt.err (!%p1235_p9)
}
 0x3ec   :  { %s1258_s26 = smov 32   ;;  %s1259_s27 = smov 2  }
 0x3ed   :  { %929 = dma.vmem_to_hbm [thread:$0]  %s924_s5, 32, %s1415_s7, [#allocation4], %s1258_s26, %s1258_s26, %s1259_s27  }
 0x3ee   :  { %1249 = dma.done.wait [#allocation4], 128  }
 0x3ef   :  { %1250 = vsyncadd [#allocation4], 4294967168 }
 0x3f0   :  { %933 = vsyncpa [#allocation3], 1 }
 0x3f1   :  { %934 = vsyncpa [#allocation4], 1 }

</bundles_post_ra>
